<compile_context>
chip_gen: v5e
topology: v5e:2x2
jax: 0.10.0
libtpu: 0.0.40
codegen_flags: <defaults>
</compile_context>

<pallas_src>
import jax
import jax.numpy as jnp
from jax.experimental import pallas as pl
from jax.experimental.pallas import tpu as pltpu

LANE = 128


def _round_up(x, m):
    return (x + m - 1) // m * m


def ensemble_kernel(emb_ref, mask_ref, wp_ref, bp_ref, wc_ref, bc_ref, out_ref):
    # emb_ref : (TB, S, Hc)  packed (3-backbone) embeddings, bf16
    # mask_ref: (TB, S)      attention mask, f32
    # wp_ref  : (Hc, Hc)     block-diagonal pooler weight (== 3 independent poolers)
    # bp_ref  : (1, Hc)      packed pooler bias
    # wc_ref  : (Hc, LANE)   classifier weight, column 0 real, rest zero (lane-dense store)
    # bc_ref  : (1, LANE)    classifier bias, column 0 real
    mask = mask_ref[...]
    emb = emb_ref[...]

    denom = jnp.maximum(jnp.sum(mask, axis=1, keepdims=True), 1.0)      # (TB, 1)
    inv_denom = pl.reciprocal(denom, approx=True)                       # EUP slot, ~free

    # Masked sum over S as a batched MXU contraction with f32 accumulation:
    # keeps the large bf16 tensor off the VPU and avoids the (TB,S,Hc) broadcast temp.
    maskq = mask.astype(emb.dtype)[:, None, :]                          # (TB, 1, S)
    pooled = jnp.einsum('bqs,bsh->bqh', maskq, emb,
                        preferred_element_type=jnp.float32)[:, 0, :]    # (TB, Hc)
    pooled = pooled * inv_denom                                         # masked mean

    # Block-diagonal pooler == tanh(Linear(pooled_i)) per backbone, on the packed stream.
    feat = jnp.tanh(
        jnp.dot(pooled, wp_ref[...], preferred_element_type=jnp.float32) + bp_ref[...])

    # torch.cat((f1,f2,f3), 1) @ Wcls + b fused into ONE matmul; output padded to 128
    # lanes so the store is an unmasked, lane-dense vst (column 0 holds the logit).
    out_ref[...] = (
        jnp.dot(feat, wc_ref[...], preferred_element_type=jnp.float32) + bc_ref[...]
    ).astype(out_ref.dtype)


def _pick_block_b(B, S, Hc, emb_itemsize, budget_bytes=24 << 20):
    """Largest multiple of 8 whose double-buffered tiles fit a conservative VMEM budget
    (safe for v7x's 32 MiB scoped / 64 MiB physical VMEM)."""
    w_bytes = (Hc * Hc + Hc + Hc * LANE + LANE) * 4          # resident weights
    per_row = 2 * (S * Hc * emb_itemsize + S * 4 + LANE * 4)  # 2x buffered emb+mask+out
    avail = max(budget_bytes - 2 * w_bytes, per_row)
    tb = max(8, (avail // per_row) // 8 * 8)
    tb = min(tb, 512)                 # bound per-step latency / codegen size
    tb = min(tb, _round_up(B, 8))
    return int(tb)


def nlp_ensemble_quad(emb1, emb2, emb3, mask,
                      wp1, bp1, wp2, bp2, wp3, bp3, wcls, bcls,
                      *, compute_dtype=jnp.bfloat16, block_b=None):
    """Fused ensemble head: masked-mean pool -> per-backbone pooler -> concat -> Linear(.,1)."""
    B, S, H1 = emb1.shape
    H2, H3 = emb2.shape[-1], emb3.shape[-1]
    Hc = H1 + H2 + H3

    # Pack the 3 backbone streams along the feature axis: one DMA stream, wider lanes,
    # and (in bf16) half the HBM bytes of the dominant (B,S,H) reads.
    emb = jnp.concatenate([emb1, emb2, emb3], axis=-1).astype(compute_dtype)
    mask_f = mask.astype(jnp.float32)

    # Block-diagonal pooler weight == three independent per-backbone poolers.
    wp = jnp.zeros((Hc, Hc), jnp.float32)
    wp = wp.at[:H1, :H1].set(wp1.astype(jnp.float32))
    wp = wp.at[H1:H1 + H2, H1:H1 + H2].set(wp2.astype(jnp.float32))
    wp = wp.at[H1 + H2:, H1 + H2:].set(wp3.astype(jnp.float32))
    bp = jnp.concatenate([bp1.reshape(1, -1), bp2.reshape(1, -1),
                          bp3.reshape(1, -1)], axis=-1).astype(jnp.float32)

    # Classifier on the concat == single (Hc, 1) matmul; pad to 128 lanes for dense stores.
    wc = jnp.zeros((Hc, LANE), jnp.float32).at[:, :1].set(wcls.reshape(Hc, 1))
    bc = jnp.zeros((1, LANE), jnp.float32).at[:, :1].set(bcls.reshape(1, 1))

    tb = block_b if block_b is not None else _pick_block_b(
        B, S, Hc, jnp.dtype(compute_dtype).itemsize)
    Bp = _round_up(B, tb)
    if Bp != B:
        # zero-pad batch; padded rows have an all-zero mask (denom clamp keeps them finite)
        emb = jnp.pad(emb, ((0, Bp - B), (0, 0), (0, 0)))
        mask_f = jnp.pad(mask_f, ((0, Bp - B), (0, 0)))

    out = pl.pallas_call(
        ensemble_kernel,
        out_shape=jax.ShapeDtypeStruct((Bp, LANE), jnp.float32),
        grid_spec=pltpu.PrefetchScalarGridSpec(
            num_scalar_prefetch=0,
            grid=(Bp // tb,),
            in_specs=[
                pl.BlockSpec((tb, S, Hc), lambda i: (i, 0, 0)),   # batch-tiled, pipelined
                pl.BlockSpec((tb, S), lambda i: (i, 0)),
                pl.BlockSpec((Hc, Hc), lambda i: (0, 0)),         # weights: resident block
                pl.BlockSpec((1, Hc), lambda i: (0, 0)),
                pl.BlockSpec((Hc, LANE), lambda i: (0, 0)),
                pl.BlockSpec((1, LANE), lambda i: (0, 0)),
            ],
            out_specs=pl.BlockSpec((tb, LANE), lambda i: (i, 0)),
        ),
        compiler_params=pltpu.CompilerParams(
            dimension_semantics=("parallel",),       # no cross-tile carry -> megacore OK
            vmem_limit_bytes=32 << 20),
    )(emb, mask_f, wp, bp, wc, bc)
    return out[:B, :1]


def embed_tokens(word_emb, type_emb, ids, token_type_ids):
    # glue: embedding gather (data-dependent, done outside the kernel)
    # TODO(synk): could be moved in-kernel via PrefetchScalarGridSpec row-gather to halve
    # HBM traffic; kept outside since the real backbones are external pretrained models.
    return jnp.take(word_emb, ids, axis=0) + jnp.take(type_emb, token_type_ids, axis=0)


def reference_forward(emb1, emb2, emb3, mask,
                      wp1, bp1, wp2, bp2, wp3, bp3, wcls, bcls):
    mask = mask.astype(jnp.float32)
    denom = jnp.maximum(jnp.sum(mask, axis=1, keepdims=True), 1.0)

    def bb(emb, wp, bp):
        pooled = jnp.sum(emb.astype(jnp.float32) * mask[:, :, None], axis=1) / denom
        return jnp.tanh(pooled @ wp + bp.reshape(1, -1))

    combined = jnp.concatenate(
        [bb(emb1, wp1, bp1), bb(emb2, wp2, bp2), bb(emb3, wp3, bp3)], axis=1)
    return combined @ wcls.reshape(-1, 1) + bcls.reshape(1, 1)


if __name__ == "__main__":
    B, S = 16, 8
    H1 = H2 = H3 = 32
    V, NTYPES = 64, 2
    H_total = H1 + H2 + H3

    key = jax.random.PRNGKey(0)
    keys = jax.random.split(key, 16)

    def lin_w(k, fan_in, shape):
        bound = 1.0 / jnp.sqrt(jnp.float32(fan_in))
        return jax.random.uniform(k, shape, jnp.float32, -bound, bound)

    # deterministic synthetic "pretrained" parameters
    we1 = jax.random.normal(keys[0], (V, H1), jnp.float32) * 0.02
    we2 = jax.random.normal(keys[1], (V, H2), jnp.float32) * 0.02
    we3 = jax.random.normal(keys[2], (V, H3), jnp.float32) * 0.02
    te1 = jax.random.normal(keys[3], (NTYPES, H1), jnp.float32) * 0.02
    te2 = jax.random.normal(keys[4], (NTYPES, H2), jnp.float32) * 0.02
    te3 = jax.random.normal(keys[5], (NTYPES, H3), jnp.float32) * 0.02

    wp1 = lin_w(keys[6], H1, (H1, H1)); bp1 = lin_w(keys[7], H1, (1, H1))
    wp2 = lin_w(keys[8], H2, (H2, H2)); bp2 = lin_w(keys[9], H2, (1, H2))
    wp3 = lin_w(keys[10], H3, (H3, H3)); bp3 = lin_w(keys[11], H3, (1, H3))

    wcls = lin_w(keys[12], H_total, (H_total, 1))
    bcls = lin_w(keys[13], H_total, (1, 1))

    # example inputs (token ids, attention mask, token type ids)
    text_features = jax.random.randint(keys[14], (B, S), 0, V, jnp.int32)
    attention_mask = jnp.ones((B, S), jnp.float32).at[:, S - 2:].set(0.0)
    token_type_ids = jnp.zeros((B, S), jnp.int32).at[:, S // 2:].set(1)

    # glue: embedding lookups per backbone (mbert1 / xlm1 / mbert2), cast to bf16 so the
    # kernel streams half the HBM bytes for the dominant (B,S,H) reads.
    emb1 = embed_tokens(we1, te1, text_features, token_type_ids).astype(jnp.bfloat16)
    emb2 = embed_tokens(we2, te2, text_features, token_type_ids).astype(jnp.bfloat16)
    emb3 = embed_tokens(we3, te3, text_features, token_type_ids).astype(jnp.bfloat16)

    out = nlp_ensemble_quad(emb1, emb2, emb3, attention_mask,
                            wp1, bp1, wp2, bp2, wp3, bp3, wcls, bcls,
                            block_b=8)        # grid=(2,) at this toy batch
    out = jax.block_until_ready(out)

    ref = reference_forward(emb1, emb2, emb3, attention_mask,
                            wp1, bp1, wp2, bp2, wp3, bp3, wcls, bcls)
    assert out.shape == (B, 1)
    assert jnp.allclose(out, ref, atol=5e-3, rtol=5e-3), \
        float(jnp.max(jnp.abs(out - ref)))

    # TODO(synk): the real mbert/xlm transformer stacks are external pretrained models;
    # they are replaced by deterministic synthetic pooled encoders above.
    print("KERNEL_OK")
</pallas_src>

<mosaic_0001>
module attributes {stable_mosaic.version = 11 : i64} {
  func.func @ensemble_kernel(%arg0: i32, %arg1: memref<8x8x96xbf16, #tpu.memory_space<vmem>>, %arg2: memref<8x8xf32, #tpu.memory_space<vmem>>, %arg3: memref<96x96xf32, #tpu.memory_space<vmem>>, %arg4: memref<1x96xf32, #tpu.memory_space<vmem>>, %arg5: memref<96x128xf32, #tpu.memory_space<vmem>>, %arg6: memref<1x128xf32, #tpu.memory_space<vmem>>, %arg7: memref<8x128xf32, #tpu.memory_space<vmem>>) attributes {dimension_semantics = [#tpu.dimension_semantics<parallel>], iteration_bounds = array<i64: 2>, scalar_prefetch = 0 : i64, scratch_operands = 0 : i64, tpu.core_type = #tpu.core_type<tc>, window_params = [{transform_indices = @transform_0, window_bounds = array<i64: 8, 8, 96>}, {transform_indices = @transform_1, window_bounds = array<i64: 8, 8>}, {pipeline_mode = #tpu.pipeline_mode<synchronous>, transform_indices = @transform_2, window_bounds = array<i64: 96, 96>}, {pipeline_mode = #tpu.pipeline_mode<synchronous>, transform_indices = @transform_3, window_bounds = array<i64: 1, 96>}, {pipeline_mode = #tpu.pipeline_mode<synchronous>, transform_indices = @transform_4, window_bounds = array<i64: 96, 128>}, {pipeline_mode = #tpu.pipeline_mode<synchronous>, transform_indices = @transform_5, window_bounds = array<i64: 1, 128>}, {transform_indices = @transform_6, window_bounds = array<i64: 8, 128>}]} {
    %c0 = arith.constant 0 : index
    %c0_0 = arith.constant 0 : index
    %0 = vector.load %arg2[%c0, %c0_0] : memref<8x8xf32, #tpu.memory_space<vmem>>, vector<8x8xf32>
    %c0_1 = arith.constant 0 : index
    %c0_2 = arith.constant 0 : index
    %c0_3 = arith.constant 0 : index
    %1 = vector.load %arg1[%c0_1, %c0_2, %c0_3] : memref<8x8x96xbf16, #tpu.memory_space<vmem>>, vector<8x8x96xbf16>
    %cst = arith.constant dense<0.000000e+00> : vector<8xf32>
    %2 = vector.multi_reduction <add>, %0, %cst [1] : vector<8x8xf32> to vector<8xf32>
    %3 = vector.shape_cast %2 : vector<8xf32> to vector<8x1xf32>
    %cst_4 = arith.constant 1.000000e+00 : f32
    %4 = vector.broadcast %cst_4 : f32 to vector<8x1xf32>
    %5 = arith.maximumf %3, %4 : vector<8x1xf32>
    %6 = tpu.reciprocal %5 {approx = true} : vector<8x1xf32> -> vector<8x1xf32>
    %7 = arith.truncf %0 : vector<8x8xf32> to vector<8x8xbf16>
    %8 = vector.shape_cast %7 : vector<8x8xbf16> to vector<8x1x8xbf16>
    "tpu.trace_start"() <{level = 10 : i32, message = "bqs,bsh->bqh"}> : () -> ()
    %cst_5 = arith.constant dense<0.000000e+00> : vector<8x1x96xf32>
    %9 = tpu.matmul %8, %1, %cst_5 {dimension_numbers = #tpu.dot_dimension_numbers<[2], [1], [1], [2], [0, 0, 0, 1, 1, 2], [0], [0]>} : vector<8x1x8xbf16>, vector<8x8x96xbf16>, vector<8x1x96xf32> -> vector<8x1x96xf32>
    "tpu.trace_stop"() : () -> ()
    %10 = vector.shape_cast %9 : vector<8x1x96xf32> to vector<8x96xf32>
    %11 = vector.broadcast %6 : vector<8x1xf32> to vector<8x96xf32>
    %12 = arith.mulf %10, %11 : vector<8x96xf32>
    %c0_6 = arith.constant 0 : index
    %c0_7 = arith.constant 0 : index
    %13 = vector.load %arg3[%c0_6, %c0_7] : memref<96x96xf32, #tpu.memory_space<vmem>>, vector<96x96xf32>
    %cst_8 = arith.constant dense<0.000000e+00> : vector<8x96xf32>
    %14 = tpu.matmul %12, %13, %cst_8 {dimension_numbers = #tpu.dot_dimension_numbers<[1], [0], [0], [1], [0, 0, 1, 1], [], []>} : vector<8x96xf32>, vector<96x96xf32>, vector<8x96xf32> -> vector<8x96xf32>
    %c0_9 = arith.constant 0 : index
    %c0_10 = arith.constant 0 : index
    %15 = vector.load %arg4[%c0_9, %c0_10] : memref<1x96xf32, #tpu.memory_space<vmem>>, vector<1x96xf32>
    %16 = vector.broadcast %15 : vector<1x96xf32> to vector<8x96xf32>
    %17 = arith.addf %14, %16 : vector<8x96xf32>
    %18 = math.tanh %17 : vector<8x96xf32>
    %c0_11 = arith.constant 0 : index
    %c0_12 = arith.constant 0 : index
    %19 = vector.load %arg5[%c0_11, %c0_12] : memref<96x128xf32, #tpu.memory_space<vmem>>, vector<96x128xf32>
    %cst_13 = arith.constant dense<0.000000e+00> : vector<8x128xf32>
    %20 = tpu.matmul %18, %19, %cst_13 {dimension_numbers = #tpu.dot_dimension_numbers<[1], [0], [0], [1], [0, 0, 1, 1], [], []>} : vector<8x96xf32>, vector<96x128xf32>, vector<8x128xf32> -> vector<8x128xf32>
    %c0_14 = arith.constant 0 : index
    %c0_15 = arith.constant 0 : index
    %21 = vector.load %arg6[%c0_14, %c0_15] : memref<1x128xf32, #tpu.memory_space<vmem>>, vector<1x128xf32>
    %22 = vector.broadcast %21 : vector<1x128xf32> to vector<8x128xf32>
    %23 = arith.addf %20, %22 : vector<8x128xf32>
    %c0_16 = arith.constant 0 : index
    %c0_17 = arith.constant 0 : index
    %24 = vector.load %arg7[%c0_16, %c0_17] : memref<8x128xf32, #tpu.memory_space<vmem>>, vector<8x128xf32>
    tpu.vector_store %arg7[%c0_16, %c0_17], %23 {strides = array<i32>} : memref<8x128xf32, #tpu.memory_space<vmem>>, vector<8x128xf32>,
    return
  }
  func.func @transform_0(%arg0: i32) -> (i32, i32, i32) {
    %c0_i32 = arith.constant 0 : i32
    %c0_i32_0 = arith.constant 0 : i32
    %c0_i32_1 = arith.constant 0 : i32
    return %arg0, %c0_i32, %c0_i32_0 : i32, i32, i32
  }
  func.func @transform_1(%arg0: i32) -> (i32, i32) {
    %c0_i32 = arith.constant 0 : i32
    %c0_i32_0 = arith.constant 0 : i32
    return %arg0, %c0_i32 : i32, i32
  }
  func.func @transform_2(%arg0: i32) -> (i32, i32) {
    %c0_i32 = arith.constant 0 : i32
    %c0_i32_0 = arith.constant 0 : i32
    %c0_i32_1 = arith.constant 0 : i32
    return %c0_i32, %c0_i32_0 : i32, i32
  }
  func.func @transform_3(%arg0: i32) -> (i32, i32) {
    %c0_i32 = arith.constant 0 : i32
    %c0_i32_0 = arith.constant 0 : i32
    %c0_i32_1 = arith.constant 0 : i32
    return %c0_i32, %c0_i32_0 : i32, i32
  }
  func.func @transform_4(%arg0: i32) -> (i32, i32) {
    %c0_i32 = arith.constant 0 : i32
    %c0_i32_0 = arith.constant 0 : i32
    %c0_i32_1 = arith.constant 0 : i32
    return %c0_i32, %c0_i32_0 : i32, i32
  }
  func.func @transform_5(%arg0: i32) -> (i32, i32) {
    %c0_i32 = arith.constant 0 : i32
    %c0_i32_0 = arith.constant 0 : i32
    %c0_i32_1 = arith.constant 0 : i32
    return %c0_i32, %c0_i32_0 : i32, i32
  }
  func.func @transform_6(%arg0: i32) -> (i32, i32) {
    %c0_i32 = arith.constant 0 : i32
    %c0_i32_0 = arith.constant 0 : i32
    return %arg0, %c0_i32 : i32, i32
  }
}

</mosaic_0001>

<bundles_post_ra>
// kernel: tpu_custom_call.1
= control target key start
LH: loop header
LB: loop body
LE: loop exit
PB: predicated region body
PF: predicated region fallthrough
CT: control target
= control target key end

     0   :  { %11 = vsyncpa [#allocation3], 0  ;;  %s1285_s0 = inlined_call_operand.hbm [shape: bf16[16,8,96], index: 0, kind: input, shape index: {}]   ;;  %s1286_s1 = inlined_call_operand.vmem [shape: f32[16,8], index: 1, kind: input, shape index: {}]   ;;  %s1287_s2 = inlined_call_operand.hbm [shape: f32[96,96], index: 2, kind: input, shape index: {}]   ;;  %s1288_s3 = inlined_call_operand.vmem [shape: f32[1,96], index: 3, kind: input, shape index: {}]   ;;  %s1289_s4 = inlined_call_operand.hbm [shape: f32[96,128], index: 4, kind: input, shape index: {}]   ;;  %s1290_s5 = inlined_call_operand.vmem [shape: f32[1,128], index: 5, kind: input, shape index: {}]   ;;  %s1291_s6 = inlined_call_operand.hbm [shape: f32[16,128], index: 6, kind: output, shape index: {}]  }
   0x1   :  { %13 = vsyncpa [#allocation3 + $0x1], 0 }
   0x2   :  { %14 = vsyncpa [#allocation6], 0 }
   0x3   :  { %15 = vsyncpa [#allocation4], 0 }
   0x4   :  { %17 = vsyncpa [#allocation4 + $0x1], 0  ;;  %s1096_s21 = smov 0   ;;  %s1098_s22 = smov 0  }
   0x5   :  { %s1100_s23 = smov 0   ;;  %s1102_s24 = smov 0  }
   0x6 LB: > { %s1117_s25 = sadd.s32 4294967295, %s1053_s24   ;;  %s783_s26 = sadd.s32 4294967294, %s1053_s24   ;;  %s1053_s24 = sphi %s1102_s24, %s1301_s24   ;;  %s1049_s23 = sphi %s1100_s23, %s1300_s23   ;;  %s1045_s22 = sphi %s1098_s22, %s1299_s22   ;;  %s1041_s21 = sphi %s1096_s21, %s1298_s21  }
   0x7   : > { %p43_p0 = scmp.ne.s32.totalorder %s1045_s22, %s1041_s21  ;;  %p44_p1 = scmp.eq.s32.totalorder %s1117_s25, 0 }
   0x8   : > { %p177_p2 = scmp.eq.s32.totalorder %s1117_s25, 1  ;;  %p183_p3 = scmp.eq.s32.totalorder %s783_s26, 1 }
   0x9   : > { %p1126_p4 = por %p44_p1, %p43_p0  ;;  %p784_p5 = scmp.ge.s32.totalorder %s1053_s24, 1 }
   0xa   : > { %p1131_p6 = por %p183_p3, %p43_p0  ;;  %p190_p7 = scmp.lt.s32.totalorder %s1053_s24, 3 }
   0xb   : > { %s201_s7 = sshll.u32 %s1287_s2, 4  ;;  %s1055_s9 = smov [#allocation5]   ;;  %s202_s7 = int_to_ptr.hbm [resolvable:$true] %s201_s7 }
   0xc   : > { %p1139_p8 = pnand %p784_p5, %p190_p7  ;;  %s203_s10 = sshll.u32 %s1055_s9, 4  ;;  %s204_s10 = int_to_ptr.vmem [resolvable:$true] %s203_s10 }
   0xd   : > { %s218_s13 = sshll.u32 %s1289_s4, 4  ;;  %s1056_s14 = smov 128   ;;  %s219_s13 = int_to_ptr.hbm [resolvable:$true] %s218_s13 }
   0xe   : > { %p828_p9 = pneg %p1139_p8  ;;  %s1057_s15 = smov 8  }
   0xf   : > { %s1058_s16 = smov [#allocation7]   ;;  %s1152_s18 = sadd.s32 1, %s1053_s24  }
  0x10   : > { %p829_p10 = pnand %p828_p9, %p44_p1  ;;  %s220_s17 = sshll.u32 %s1058_s16, 4  ;;  %s221_s17 = int_to_ptr.vmem [resolvable:$true] %s220_s17 }
  0x11   : > { %s30_s19 = sadd.s32 1, %s1049_s23  ;;  %s27_s20 = ssub.s32 %s1053_s24, %s1152_s18 }
  0x12   : > { %831 = dma.hbm_to_vmem [thread:$0]  (!%p829_p10), %s202_s7, 1536, %s204_s10, [#allocation6], %s1056_s14, %s1056_s14, %s1057_s15  }
  0x13   : > { %834 = dma.hbm_to_vmem [thread:$0]  (!%p829_p10), %s219_s13, 1536, %s221_s17, [#allocation6], %s1056_s14, %s1056_s14, %s1057_s15  }
  0x14   : > { %p37_p12 = scmp.ne.s32.totalorder %s1049_s23, %s1045_s22  ;;  %p28_p13 = scmp.eq.s32.totalorder %s27_s20, 0 }
  0x15   : > { %p38_p0 = scmp.eq.s32.totalorder %s1053_s24, 0  ;;  %p845_p5 = scmp.lt.s32.totalorder %s1053_s24, 2 }
  0x16   : > { %p1162_p3 = por %p177_p2, %p37_p12  ;;  %s237_s30 = sand.u32 1, %s1049_s23  }
  0x17   : > { %s1168_s29 = scalar_select %p28_p13, %s1049_s23, %s30_s19  }
  0x18   : > { %p39_p7 = por %p38_p0, %p37_p12  ;;  %s788_s7 = sshll.u32 %s237_s30, 5 }
  0x19   : > { %s815_s9 = sshll.u32 %s1053_s24, 5  ;;  %s241_s13 = scalar_lea.vmem [#allocation2], %s788_s7 }
  0x1a   : > { %s246_s12 = scalar_lea.hbm %s1285_s0, %s815_s9  ;;  %s249_s14 = sshll.u32 %s241_s13, 4  ;;  %s250_s14 = int_to_ptr.vmem [resolvable:$true] %s249_s14 }
  0x1b   : > { %s247_s15 = sshll.u32 %s246_s12, 4  ;;  %p1175_p2 = pnand %p845_p5, %p39_p7  ;;  %s248_s15 = int_to_ptr.hbm [resolvable:$true] %s247_s15 }
  0x1c   : > { %s238_s17 = scalar_lea.sflag [#allocation3], %s237_s30  ;;  %s953_s19 = sshra.s32 %s248_s15, 4  ;;  %s954_s19 = int_to_ptr.hbm [resolvable:$true] %s953_s19 }
  0x1d   : > { %s955_s20 = scalar_lea.hbm %s954_s19, 32  ;;  %p957_p10 = pneg %p1175_p2 }
  0x1e   : > { %p956_p9 = scmp.ne.s32.totalorder %s954_s19, %s955_s20  ;;  %s960_s10 = scalar_lea.hbm %s1285_s0, 64 }
  0x1f   : > { %p961_p0 = scmp.lt.s32.totalorder %s954_s19, %s1285_s0  ;;  %p962_p5 = scmp.lt.s32.totalorder %s960_s10, %s955_s20 }
  0x20   : > { %p958_p12 = pnand %p957_p10, %p956_p9 }
  0x21   : > { %p963_p7 = por %p962_p5, %p961_p0 }
  0x22   : > { %p959_p13 = pneg %p958_p12 }
  0x24   : > { %p964_p11 = pnand %p963_p7, %p959_p13 }
  0x26   : > { %967 = shalt.err (!%p964_p11)
}
  0x27   : > { %s1059_s30 = smov 64   ;;  %s1060_s13 = smov 4  }
  0x28   : > { %838 = dma.hbm_to_vmem [thread:$0]  (!%p1175_p2), %s248_s15, 512, %s250_s14, %s238_s17, %s1059_s30, %s1059_s30, %s1060_s13  }
  0x29   : > { %268 = sbr.rel (%p1139_p8) target bundleno = 488 (0x1e8), region = 44  ;;  %s1192_s9 = sand.u32 (!%p1139_p8), 1, %s1045_s22  }
  0x2a   : > { %s792_s7 = sshll.u32 (!%p1139_p8), %s1192_s9, 5  ;;  %s271_s19 = scalar_lea.sflag (!%p1139_p8), [#allocation3], %s1192_s9 }
  0x2b   : > { %s1196_s20 = scalar_lea.vmem (!%p1139_p8), [#allocation2], %s792_s7 }
  0x2e   : > { %1028 = dma.done.wait (%p1126_p4), %s271_s19, 512  }
  0x2f   : > { %1030 = vsyncadd (%p1126_p4), %s271_s19, 4294966784 }
  0x30   : > { %1032 = dma.done.wait (%p44_p1), [#allocation6], 3072  }
  0x31   : > { %1034 = vsyncadd (%p44_p1), [#allocation6], 4294964224  ;;  %p319_p8 = scmp.lt.s32.totalorder %s1117_s25, 1  ;;  %vm372_vm0 = vcmask 1043456   ;;  %vm333_vm1 = vcmask 64512   ;;  %vm342_vm2 = vcmask 1040384  }
  0x32   : > { %vm347_vm3 = vcmask 1041409   ;;  %v325_v0 = vld [vmem:[%s1196_s20] sm:$0xf]  ;;  %v326_v1 = vld [vmem:[%s1196_s20 + $0x4] sm:$0xf]  ;;  %vm351_vm4 = vcmask 1042434  }
  0x33   : > { %s320_s8 = scalar_select %p319_p8, %s1117_s25, 1  ;;  %v327_v2 = vld [vmem:[%s1196_s20 + $0x8] sm:$0xf]  ;;  %v374_v3 = vsel %vm372_vm0, %v325_v0, 0  ;;  %v395_v4 = vsel %vm372_vm0, %v326_v1, 0  ;;  %vm355_vm5 = vcmask 1043459  }
  0x34   : > { %v416_v5 = vsel %vm372_vm0, %v327_v2, 0  ;;  %v328_v7 = vld [vmem:[%s1196_s20 + $0xc] sm:$0xf]  ;;  %383 = vmatpush.bf16.msra.mxu0 %v374_v3  ;;  %404 = vmatpush.bf16.msra.mxu1 %v395_v4  ;;  %v331_v10 = vld [vmem:[%s1196_s20 + $0x18] sm:$0xf]  ;;  %v570_v48 = vld [vmem:[#allocation5 + $0x50] sm:$0xff] }
  0x35   : > { %s796_s14 = sshll.u32 %s320_s8, 3  ;;  %v437_v9 = vsel %vm372_vm0, %v328_v7, 0  ;;  %v332_v12 = vld [vmem:[%s1196_s20 + $0x1c] sm:$0xf]  ;;  %425 = vmatpush.bf16.msra.mxu2 %v416_v5  ;;  %v500_v13 = vsel %vm372_vm0, %v331_v10, 0  ;;  %v569_v49 = vld [vmem:[#allocation5 + $0x48] sm:$0xff] }
  0x36   : > { %s322_s27 = scalar_lea.vmem %s1286_s1, %s796_s14  ;;  %446 = vmatpush.bf16.msra.mxu3 %v437_v9  ;;  %v521_v14 = vsel %vm372_vm0, %v332_v12, 0  ;;  %v329_v15 = vld [vmem:[%s1196_s20 + $0x10] sm:$0xf]  ;;  %v330_v16 = vld [vmem:[%s1196_s20 + $0x14] sm:$0xf]  ;;  %v571_v47 = vld [vmem:[#allocation5 + $0x58] sm:$0xff] }
  0x37   : > { %v324_v6 = vld [vmem:[%s322_s27] sm:$0xff]  ;;  %v458_v18 = vsel %vm372_vm0, %v329_v15, 0  ;;  %v479_v19 = vsel %vm372_vm0, %v330_v16, 0  ;;  %v567_v51 = vld [vmem:[#allocation5 + $0x38] sm:$0xff]  ;;  %v566_v52 = vld [vmem:[#allocation5 + $0x30] sm:$0xff]  ;;  %vm591_vm6 = vcmask 1044484  }
  0x38   : > { %v339_v8 = vpack.c.bf16 %v324_v6, %v324_v6  ;;  %v334_v11 = vsel %vm333_vm1, %v324_v6, 0.0  ;;  %467 = vmatpush.bf16.msrb.mxu0 %v458_v18  ;;  %488 = vmatpush.bf16.msrb.mxu1 %v479_v19  ;;  %v568_v50 = vld [vmem:[#allocation5 + $0x40] sm:$0xff]  ;;  %v565_v53 = vld [vmem:[#allocation5 + $0x28] sm:$0xff]  ;;  %v563_v56 = vld [vmem:[#allocation5 + $0x18] sm:$0xff]  ;;  %vm594_vm7 = vcmask 1045509   ;;  %vm597_vm8 = vcmask 1046534  }
  0x39   : > { %509 = vmatpush.bf16.msrb.mxu2 %v500_v13  ;;  %335 = vadd.xlane.f32.xlu0 %v334_v11  ;;  %v564_v54 = vld [vmem:[#allocation5 + $0x20] sm:$0xff]  ;;  %v562_v57 = vld [vmem:[#allocation5 + $0x10] sm:$0xff]  ;;  %v561_v59 = vld [vmem:[#allocation5 + $0x8] sm:$0xff]  ;;  %vm600_vm9 = vcmask 1047559   ;;  %vm602_vm10 = vcmask 785408   ;;  %s795_s11 = sshll.u32 %s1192_s9, 3 }
  0x3a   : > { %v341_v17 = vrot.slane %v339_v8, 3  ;;  %530 = vmatpush.bf16.msrb.mxu3 %v521_v14  ;;  %v560_v60 = vld [vmem:[#allocation5] sm:$0xff]  ;;  %v637_v63 = vld [vmem:[#allocation7 + $0x58] sm:$0xff]  ;;  %v636_v0 = vld [vmem:[#allocation7 + $0x50] sm:$0xff]  ;;  %s812_s12 = sshll.u32 %s1117_s25, 3  ;;  %s317_s8 = scalar_lea.vmem [#allocation8], %s795_s11 }
  0x3b   : > { %v635_v1 = vld [vmem:[#allocation7 + $0x48] sm:$0xff]  ;;  %v634_v3 = vld [vmem:[#allocation7 + $0x40] sm:$0xff]  ;;  %v633_v7 = vld [vmem:[#allocation7 + $0x38] sm:$0xff]  ;;  %s677_s7 = scalar_lea.hbm %s1291_s6, %s812_s12  ;;  %s679_s14 = sshll.u32 %s317_s8, 4  ;;  %s680_s14 = int_to_ptr.vmem [resolvable:$true] %s679_s14 }
  0x3c   : > { %v345_v20 = vsel %vm342_vm2, %v339_v8, %v341_v17  ;;  %v348_v21 = vsel %vm347_vm3, %v339_v8, %v341_v17  ;;  %v352_v29 = vsel %vm351_vm4, %v339_v8, %v341_v17  ;;  %v356_v33 = vsel %vm355_vm5, %v339_v8, %v341_v17  ;;  %v632_v11 = vld [vmem:[#allocation7 + $0x30] sm:$0xff]  ;;  %v631_v14 = vld [vmem:[#allocation7 + $0x28] sm:$0xff]  ;;  %s681_s15 = sshll.u32 %s677_s7, 4  ;;  %s667_s16 = scalar_lea.sflag [#allocation4], %s1192_s9  ;;  %s682_s15 = int_to_ptr.hbm [resolvable:$true] %s681_s15 }
  0x3d   : > { %v797_v22 = vpack.i.b16 %v345_v20, %v345_v20  ;;  %v360_v23 = vunpack.i.h.s16 %v345_v20  ;;  %v350_v24 = vrot.slane %v348_v21, 1  ;;  %v354_v35 = vrot.slane %v352_v29, 2  ;;  %s997_s27 = sshra.s32 %s682_s15, 4  ;;  %s1003_s12 = scalar_lea.hbm %s1291_s6, 16  ;;  %s998_s27 = int_to_ptr.hbm [resolvable:$true] %s997_s27 }
  0x3e   : > { %v358_v36 = vrot.slane %v356_v33, 3  ;;  %s999_s25 = scalar_lea.hbm %s998_s27, 8  ;;  %p1004_p2 = scmp.lt.s32.totalorder %s998_s27, %s1291_s6 }
  0x3f   : > { %v368_v25 = vperm.slane %v797_v22, 0  ;;  %v389_v26 = vpack.i.b16 %v360_v23, %v360_v23  ;;  %v800_v27 = vpack.i.b16 %v350_v24, %v350_v24  ;;  %v362_v28 = vunpack.i.h.s16 %v350_v24  ;;  %p1000_p1 = scmp.ne.s32.totalorder %s998_s27, %s999_s25  ;;  %p1005_p9 = scmp.lt.s32.totalorder %s1003_s12, %s999_s25 }
  0x40   : > { %v364_v37 = vunpack.i.h.s16 %v354_v35  ;;  %v803_v38 = vpack.i.b16 %v354_v35, %v354_v35  ;;  %v366_v39 = vunpack.i.h.s16 %v358_v36  ;;  %v806_v41 = vpack.i.b16 %v358_v36, %v358_v36 }
  0x41   : > { %798 = vmatmul.msk.bf16.vlgmr.msra.gmra.mxu0 %vm333_vm1, %v368_v25  ;;  %v390_v30 = vperm.slane %v389_v26, 0  ;;  %v411_v31 = vperm.slane %v800_v27, 0  ;;  %v431_v32 = vpack.i.b16 %v362_v28, %v362_v28  ;;  %p1001_p4 = pnand %p1000_p1, %p1162_p3  ;;  %p1006_p10 = por %p1005_p9, %p1004_p2 }
  0x42   : > { %v473_v40 = vpack.i.b16 %v364_v37, %v364_v37  ;;  %v453_v42 = vperm.slane %v803_v38, 0  ;;  %v515_v43 = vpack.i.b16 %v366_v39, %v366_v39  ;;  %v495_v45 = vperm.slane %v806_v41, 0  ;;  %609 = vmatpush.msra.mxu0 %v571_v47 }
  0x43   : > { %799 = vmatmul.msk.bf16.vlgmr.msra.gmra.mxu1 %vm333_vm1, %v390_v30  ;;  %801 = vmatmul.msk.bf16.vlgmr.msra.gmra.mxu2 %vm333_vm1, %v411_v31  ;;  %v432_v34 = vperm.slane %v431_v32, 0  ;;  %p1002_p11 = pneg %p1001_p4 }
  0x44   : > { %v474_v44 = vperm.slane %v473_v40, 0  ;;  %v516_v46 = vperm.slane %v515_v43, 0  ;;  %610 = vmatpush.msra.mxu0 %v570_v48  ;;  %649 = vmatpush.msra.mxu1 %v637_v63 }
  0x45   : > { %802 = vmatmul.msk.bf16.vlgmr.msra.gmra.mxu3 %vm333_vm1, %v432_v34  ;;  %p1007_p12 = pnand %p1006_p10, %p1002_p11 }
  0x46   : > { %611 = vmatpush.msra.mxu0 %v569_v49  ;;  %650 = vmatpush.msra.mxu1 %v636_v0 }
  0x48   : > { %612 = vmatpush.msra.mxu0 %v568_v50  ;;  %651 = vmatpush.msra.mxu1 %v635_v1  ;;  %v630_v50 = vld [vmem:[#allocation7 + $0x20] sm:$0xff] }
  0x4a   : > { %613 = vmatpush.msra.mxu0 %v567_v51  ;;  %652 = vmatpush.msra.mxu1 %v634_v3  ;;  %v629_v51 = vld [vmem:[#allocation7 + $0x18] sm:$0xff] }
  0x4c   : > { %614 = vmatpush.msra.mxu0 %v566_v52  ;;  %653 = vmatpush.msra.mxu1 %v633_v7  ;;  %v628_v52 = vld [vmem:[#allocation7 + $0x10] sm:$0xff] }
  0x4e   : > { %615 = vmatpush.msra.mxu0 %v565_v53  ;;  %654 = vmatpush.msra.mxu1 %v632_v11  ;;  %v627_v53 = vld [vmem:[#allocation7 + $0x8] sm:$0xff] }
  0x50   : > { %616 = vmatpush.msra.mxu0 %v564_v54  ;;  %655 = vmatpush.msra.mxu1 %v631_v14  ;;  %v626_v54 = vld [vmem:[#allocation7] sm:$0xff] }
  0x51   : > { %804 = vmatmul.msk.bf16.vlgmr.msrb.gmra.mxu0 %vm333_vm1, %v453_v42 }
  0x52   : > { %617 = vmatpush.msra.mxu0 %v563_v56  ;;  %656 = vmatpush.msra.mxu1 %v630_v50 }
  0x53   : > { %805 = vmatmul.msk.bf16.vlgmr.msrb.gmra.mxu1 %vm333_vm1, %v474_v44  ;;  %807 = vmatmul.msk.bf16.vlgmr.msrb.gmra.mxu2 %vm333_vm1, %v495_v45 }
  0x54   : > { %618 = vmatpush.msra.mxu0 %v562_v57  ;;  %657 = vmatpush.msra.mxu1 %v629_v51 }
  0x55   : > { %808 = vmatmul.msk.bf16.vlgmr.msrb.gmra.mxu3 %vm333_vm1, %v516_v46 }
  0x56   : > { %619 = vmatpush.msra.mxu0 %v561_v59  ;;  %658 = vmatpush.msra.mxu1 %v628_v52  ;;  %v888_v59 = vld [vmem:[%s1290_s5] ss:$0 sm:$0xff] }
  0x58   : > { %620 = vmatpush.msra.mxu0 %v560_v60  ;;  %659 = vmatpush.msra.mxu1 %v627_v53 }
  0x5a   : > { %660 = vmatpush.msra.mxu1 %v626_v54 }
  0xac   : > { %v336_v55 = vpop.xlane.xlu0 %335 }
  0xad   : > { %v337_v58 = vmax.f32 %v336_v55, 1.0  ;;  %v887_v55 = vld [vmem:[%s1288_s3] ss:$0 sm:$0xff] }
  0xaf   : > { %889 = vrcp.f32 %v337_v58 }
  0xb5   : > { %v890_v2 = vpop.eup %889 }
  0xb6   : > { %v537_v4 = vrot.slane %v890_v2, 1  ;;  %v538_v8 = vrot.slane %v890_v2, 2  ;;  %v539_v13 = vrot.slane %v890_v2, 3  ;;  %v540_v16 = vrot.slane %v890_v2, 4 }
  0xb7   : > { %v541_v22 = vrot.slane %v890_v2, 5  ;;  %v542_v32 = vrot.slane %v890_v2, 6  ;;  %v543_v39 = vrot.slane %v890_v2, 7 }
  0xbe   : > { %v385_v61 = vpop.f32.mrf.mxu0 }
  0xbf   : > { %v552_v17 = vmul.f32 %v890_v2, %v385_v61 }
  0xc0   : > { %v406_v62 = vpop.f32.mrf.mxu1 }
  0xc1   : > { %v553_v12 = vmul.f32 %v537_v4, %v406_v62 }
  0xc3   : > { %v584_v18 = vrot.slane %v553_v12, 7 }
  0xc5   : > { %v585_v27 = vsel %vm347_vm3, %v584_v18, %v552_v17 }
  0xc6   : > { %v387_v5 = vpop.f32.mrf.mxu0  ;;  %v427_v6 = vpop.f32.mrf.mxu2 }
  0xc7   : > { %v554_v15 = vmul.f32 %v538_v8, %v427_v6 }
  0xc8   : > { %v408_v9 = vpop.f32.mrf.mxu1  ;;  %v448_v10 = vpop.f32.mrf.mxu3 }
  0xc9   : > { %v555_v19 = vmul.f32 %v539_v13, %v448_v10  ;;  %v586_v23 = vrot.slane %v554_v15, 6 }
  0xcb   : > { %v588_v28 = vrot.slane %v555_v19, 5  ;;  %v587_v30 = vsel %vm351_vm4, %v586_v23, %v585_v27 }
  0xcd   : > { %v589_v33 = vsel %vm355_vm5, %v588_v28, %v587_v30 }
  0xce   : > { %v429_v20 = vpop.f32.mrf.mxu2  ;;  %v469_v21 = vpop.f32.mrf.mxu0 }
  0xcf   : > { %v556_v24 = vmul.f32 %v540_v16, %v469_v21 }
  0xd0   : > { %v450_v25 = vpop.f32.mrf.mxu3  ;;  %v490_v26 = vpop.f32.mrf.mxu1 }
  0xd1   : > { %v557_v29 = vmul.f32 %v541_v22, %v490_v26  ;;  %v590_v31 = vrot.slane %v556_v24, 4 }
  0xd3   : > { %v593_v34 = vrot.slane %v557_v29, 3  ;;  %v592_v37 = vsel %vm591_vm6, %v590_v31, %v589_v33 }
  0xd5   : > { %v595_v44 = vsel %vm594_vm7, %v593_v34, %v592_v37 }
  0xd6   : > { %v471_v35 = vpop.f32.mrf.mxu0  ;;  %v511_v36 = vpop.f32.mrf.mxu2 }
  0xd7   : > { %v558_v38 = vmul.f32 %v542_v32, %v511_v36 }
  0xd8   : > { %v492_v40 = vpop.f32.mrf.mxu1  ;;  %v532_v41 = vpop.f32.mrf.mxu3 }
  0xd9   : > { %v596_v42 = vrot.slane %v558_v38, 2  ;;  %v559_v43 = vmul.f32 %v543_v39, %v532_v41 }
  0xdb   : > { %v598_v45 = vsel %vm597_vm8, %v596_v42, %v595_v44  ;;  %v599_v46 = vrot.slane %v559_v43, 1 }
  0xdd   : > { %v601_v47 = vsel %vm600_vm9, %v599_v46, %v598_v45 }
  0xde   : > { %v513_v48 = vpop.f32.mrf.mxu2  ;;  %809 = vmatmul.msk.f32.vlgmr.msra.gmra.mxu0 %vm602_vm10, %v601_v47 }
  0xe0   : > { %v534_v49 = vpop.f32.mrf.mxu3 }
 0x15b   : > { %v622_v56 = vpop.f32.mrf.mxu0 }
 0x15c   : > { %v623_v57 = vadd.f32 %v887_v55, %v622_v56 }
 0x15e   : > { %891 = vtanh.f32 %v623_v57 }
 0x164   : > { %v892_v58 = vpop.eup %891 }
 0x165   : > { %810 = vmatmul.msk.f32.vlgmr.msra.gmra.mxu1 %vm602_vm10, %v892_v58 }
 0x1e2   : > { %v662_v60 = vpop.f32.mrf.mxu1 }
 0x1e3   : > { %v663_v61 = vadd.f32 %v888_v59, %v662_v60 }
 0x1e5   : > { %665 = vst [vmem:[%s317_s8] sm:$0xff] %v663_v61 }
 0x1e6   : > { %1010 = shalt.err (!%p1007_p12)
}
 0x1e7   : > { %826 = dma.vmem_to_hbm [thread:$0]  (%p1162_p3), %s680_s14, 128, %s682_s15, %s667_s16  }
 0x1e8 PF: > { %s693_s9 = sand.u32 1, %s1041_s21   ;;  %p1297_p13 = scmp.ge.s32.totalorder %s1053_s24, 2 }
 0x1e9   : > { %s694_s13 = scalar_lea.sflag [#allocation4], %s693_s9 }
 0x1ea   : > { %p840_p0 = pnand %p1297_p13, %p1131_p6 }
 0x1ec   : > { %p841_p5 = pneg %p840_p0 }
 0x1ee   : > { %1036 = dma.done.wait (%p841_p5), %s694_s13, 128  }
 0x1ef   : > { %1038 = vsyncadd (%p841_p5), %s694_s13, 4294967168  ;;  %p20_p7 = scmp.ge.s32.totalorder %s1152_s18, 4   ;;  %s1298_s21 = smov %s1045_s22 }
 0x1f0   : > { %s1299_s22 = smov %s1049_s23  ;;  %s1300_s23 = smov %s1168_s29 }
 0x1f1   : > { %s1301_s24 = smov %s1152_s18  ;;  %22 = sbr.rel (!%p20_p7) target bundleno = 6 (0x6), region = 100 }
 0x1f6   :  { %700 = vsyncpa [#allocation3], 1 }
 0x1f7   :  { %702 = vsyncpa [#allocation3 + $0x1], 1 }
 0x1f8   :  { %703 = vsyncpa [#allocation6], 1 }
 0x1f9   :  { %704 = vsyncpa [#allocation4], 1 }
 0x1fa   :  { %706 = vsyncpa [#allocation4 + $0x1], 1 }

</bundles_post_ra>
